<compile_context>
chip_gen: v6e
topology: v6e:2x2x1
jax: 0.10.0
libtpu: 0.0.40
codegen_flags: <defaults>
</compile_context>

<pallas_src>
import math

import jax
import jax.numpy as jnp
from jax.experimental import pallas as pl
from jax.experimental.pallas import tpu as pltpu


def _round_up(x, m):
    return ((x + m - 1) // m) * m


# ---------------------------------------------------------------------------
# Kernel: one (tm, K) row tile of the fused [x | h] activations against the
# resident packed weight (K, 4*Hp). Gate order along 4*Hp matches torch.chunk:
# [i | f | g | o], each gate padded to Hp (multiple of 128) -> lane-aligned
# slices and full-lane output stores.
# ---------------------------------------------------------------------------
def _lstm_cell_kernel(xh_ref, c_ref, w_ref, b_ref, h_next_ref, c_next_ref):
    # Single fused MXU pass, f32 accumulation:
    #   gates = [x | h_prev] @ [Wi^T ; Wh^T] + (bi + bh)
    gates = jnp.dot(xh_ref[...], w_ref[...], preferred_element_type=jnp.float32)
    gates = gates + b_ref[...]            # bias is already f32 (bi + bh)

    Hp = h_next_ref.shape[-1]
    i_gate = jax.nn.sigmoid(gates[:, 0 * Hp:1 * Hp])
    f_gate = jax.nn.sigmoid(gates[:, 1 * Hp:2 * Hp])
    g_gate = jnp.tanh(gates[:, 2 * Hp:3 * Hp])
    o_gate = jax.nn.sigmoid(gates[:, 3 * Hp:4 * Hp])

    c_prev = c_ref[...].astype(jnp.float32)
    c_next = f_gate * c_prev + i_gate * g_gate
    h_next = o_gate * jnp.tanh(c_next)

    h_next_ref[...] = h_next.astype(h_next_ref.dtype)
    c_next_ref[...] = c_next.astype(c_next_ref.dtype)


# ---------------------------------------------------------------------------
# One-time parameter packing (do this OUTSIDE the per-step call path).
# ---------------------------------------------------------------------------
def prepare_lstm_params(Wi, Wh, bi, bh, compute_dtype=jnp.bfloat16):
    """Pack PyTorch-convention LSTM weights for the Pallas kernel.

    Wi: (4H, I), Wh: (4H, H), bi/bh: (4H,)
    Returns:
      W_packed: (Ip + Hp, 4*Hp) compute_dtype -- [Wi^T ; Wh^T], zero padded,
                gate k's H real columns placed at lane-aligned offset k*Hp.
      b_packed: (1, 4*Hp) float32 -- bi + bh (summed in f32), padded likewise.
    """
    fourH, I = Wi.shape
    H = fourH // 4
    Ip = _round_up(I, 128)
    Hp = _round_up(H, 128)

    W = jnp.zeros((Ip + Hp, 4 * Hp), jnp.float32)
    b = jnp.zeros((1, 4 * Hp), jnp.float32)
    bias = bi.astype(jnp.float32) + bh.astype(jnp.float32)
    for k in range(4):
        wi_k = Wi[k * H:(k + 1) * H, :].astype(jnp.float32).T   # (I, H)
        wh_k = Wh[k * H:(k + 1) * H, :].astype(jnp.float32).T   # (H, H)
        W = W.at[:I, k * Hp:k * Hp + H].set(wi_k)
        W = W.at[Ip:Ip + H, k * Hp:k * Hp + H].set(wh_k)
        b = b.at[0, k * Hp:k * Hp + H].set(bias[k * H:(k + 1) * H])
    return W.astype(compute_dtype), b


# ---------------------------------------------------------------------------
# Forward wrapper.
# ---------------------------------------------------------------------------
def lstm_cell_forward(X, h_prev, c_prev, W_packed, b_packed,
                      compute_dtype=jnp.bfloat16):
    """X: (B,T,I), h_prev/c_prev: (B,T,H). Returns (h_next, c_next): (B,T,H)."""
    B, T, I = X.shape
    H = h_prev.shape[-1]
    M = B * T

    Ip = _round_up(I, 128)
    Hp = _round_up(H, 128)
    K = Ip + Hp
    assert W_packed.shape == (K, 4 * Hp), "weights not packed for these dims"
    assert b_packed.shape == (1, 4 * Hp)

    # ---- pick the row-tile size from a portable VMEM budget (v7x: 64 MiB) --
    bpe = jnp.dtype(compute_dtype).itemsize
    per_row = (2 * K * bpe          # xh tile (double-buffered)
               + 2 * Hp * 4         # c_prev tile f32 (double-buffered)
               + 2 * 2 * Hp * 4     # h_next / c_next tiles (double-buffered)
               + 4 * Hp * 4)        # f32 gates intermediate
    resident = 2 * (K * 4 * Hp * bpe + 4 * Hp * 4)   # weight + bias buffers
    budget = 40 * 1024 * 1024
    tm = 512
    while tm > 16 and resident + tm * per_row > budget:
        tm //= 2
    tm = min(tm, _round_up(M, 16))
    Mp = _round_up(M, tm)
    grid = (Mp // tm,)

    needed = resident + tm * per_row
    vmem_limit = int(min(max(2 * needed, 16 << 20), 48 << 20))

    # ---- pad & pack activations (padding columns/rows are zero) ------------
    x2 = X.reshape(M, I).astype(compute_dtype)
    h2 = h_prev.reshape(M, H).astype(compute_dtype)
    c2 = c_prev.reshape(M, H).astype(jnp.float32)

    x_pad = jnp.pad(x2, ((0, Mp - M), (0, Ip - I)))
    h_pad = jnp.pad(h2, ((0, Mp - M), (0, Hp - H)))
    xh = jnp.concatenate([x_pad, h_pad], axis=1)            # (Mp, K) bf16
    c_pad = jnp.pad(c2, ((0, Mp - M), (0, Hp - H)))          # (Mp, Hp) f32

    out_dtype = X.dtype
    cost = pl.CostEstimate(
        flops=2 * M * (I + H) * 4 * H,
        transcendentals=5 * M * H,
        bytes_accessed=(Mp * K * bpe + Mp * Hp * 4
                        + K * 4 * Hp * bpe + 4 * Hp * 4
                        + 2 * Mp * Hp * jnp.dtype(out_dtype).itemsize),
    )

    h_out, c_out = pl.pallas_call(
        _lstm_cell_kernel,
        out_shape=(jax.ShapeDtypeStruct((Mp, Hp), out_dtype),
                   jax.ShapeDtypeStruct((Mp, Hp), out_dtype)),
        grid=grid,
        in_specs=[
            pl.BlockSpec((tm, K), lambda i: (i, 0)),          # xh row tile
            pl.BlockSpec((tm, Hp), lambda i: (i, 0)),         # c_prev row tile
            pl.BlockSpec((K, 4 * Hp), lambda i: (0, 0)),      # resident weights
            pl.BlockSpec((1, 4 * Hp), lambda i: (0, 0)),      # resident bias
        ],
        out_specs=(pl.BlockSpec((tm, Hp), lambda i: (i, 0)),
                   pl.BlockSpec((tm, Hp), lambda i: (i, 0))),
        compiler_params=pltpu.CompilerParams(
            dimension_semantics=("parallel",),
            vmem_limit_bytes=vmem_limit),
        cost_estimate=cost,
    )(xh, c_pad, W_packed, b_packed)

    h_next = h_out[:M, :H].reshape(B, T, H)
    c_next = c_out[:M, :H].reshape(B, T, H)
    return h_next, c_next


# ---------------------------------------------------------------------------
# Init + references (for the correctness check in __main__).
# ---------------------------------------------------------------------------
def _init_params(key, input_size, hidden_size, dtype=jnp.float32):
    """Mirrors reset_parameters: U(-stdv, stdv)."""
    stdv = 1.0 / math.sqrt(hidden_size) if hidden_size > 0 else 0.0
    k1, k2, k3, k4 = jax.random.split(key, 4)
    Wi = jax.random.uniform(k1, (4 * hidden_size, input_size), dtype,
                            minval=-stdv, maxval=stdv)
    Wh = jax.random.uniform(k2, (4 * hidden_size, hidden_size), dtype,
                            minval=-stdv, maxval=stdv)
    bi = jax.random.uniform(k3, (4 * hidden_size,), dtype,
                            minval=-stdv, maxval=stdv)
    bh = jax.random.uniform(k4, (4 * hidden_size,), dtype,
                            minval=-stdv, maxval=stdv)
    return Wi, Wh, bi, bh


def _reference_forward(X, h_prev, c_prev, Wi, Wh, bi, bh,
                       compute_dtype=jnp.float32):
    """Pure-JAX reference of the PyTorch forward (optionally bf16 matmul inputs)."""
    Xc = X.astype(compute_dtype)
    hc = h_prev.astype(compute_dtype)
    gates = (jnp.dot(Xc, Wi.T.astype(compute_dtype),
                     preferred_element_type=jnp.float32)
             + jnp.dot(hc, Wh.T.astype(compute_dtype),
                       preferred_element_type=jnp.float32)
             + (bi.astype(jnp.float32) + bh.astype(jnp.float32)))
    H = h_prev.shape[-1]
    i = jax.nn.sigmoid(gates[..., 0:H])
    f = jax.nn.sigmoid(gates[..., H:2 * H])
    g = jnp.tanh(gates[..., 2 * H:3 * H])
    o = jax.nn.sigmoid(gates[..., 3 * H:4 * H])
    c_next = f * c_prev.astype(jnp.float32) + i * g
    h_next = o * jnp.tanh(c_next)
    return h_next.astype(X.dtype), c_next.astype(X.dtype)


if __name__ == "__main__":
    batch, seq, input_size, hidden_size = 2, 8, 16, 32

    key = jax.random.PRNGKey(0)
    kp, kx, kh, kc = jax.random.split(key, 4)

    Wi, Wh, bi, bh = _init_params(kp, input_size, hidden_size)

    X = jax.random.normal(kx, (batch, seq, input_size), jnp.float32)
    h_prev = jax.random.normal(kh, (batch, seq, hidden_size), jnp.float32)
    c_prev = jax.random.normal(kc, (batch, seq, hidden_size), jnp.float32)

    # Pack/transpose weights ONCE, outside the per-step call path.
    W_packed, b_packed = prepare_lstm_params(Wi, Wh, bi, bh)

    fwd = jax.jit(lstm_cell_forward)
    h_next, c_next = fwd(X, h_prev, c_prev, W_packed, b_packed)
    jax.block_until_ready((h_next, c_next))

    assert h_next.shape == (batch, seq, hidden_size)
    assert c_next.shape == (batch, seq, hidden_size)

    # Tight check against a reference that uses the same bf16 matmul inputs.
    h_refb, c_refb = _reference_forward(X, h_prev, c_prev, Wi, Wh, bi, bh,
                                        compute_dtype=jnp.bfloat16)
    assert jnp.allclose(h_next, h_refb, atol=1e-2, rtol=1e-2)
    assert jnp.allclose(c_next, c_refb, atol=1e-2, rtol=1e-2)

    # Looser check against the pure-f32 PyTorch-semantics reference.
    h_ref32, c_ref32 = _reference_forward(X, h_prev, c_prev, Wi, Wh, bi, bh)
    assert jnp.allclose(h_next, h_ref32, atol=5e-2, rtol=5e-2)
    assert jnp.allclose(c_next, c_ref32, atol=5e-2, rtol=5e-2)

    print("KERNEL_OK")
</pallas_src>

<mosaic_0001>
module attributes {stable_mosaic.version = 11 : i64} {
  func.func @_lstm_cell_kernel(%arg0: i32, %arg1: memref<16x256xbf16, #tpu.memory_space<vmem>>, %arg2: memref<16x128xf32, #tpu.memory_space<vmem>>, %arg3: memref<256x512xbf16, #tpu.memory_space<vmem>>, %arg4: memref<1x512xf32, #tpu.memory_space<vmem>>, %arg5: memref<16x128xf32, #tpu.memory_space<vmem>>, %arg6: memref<16x128xf32, #tpu.memory_space<vmem>>) attributes {dimension_semantics = [#tpu.dimension_semantics<parallel>], iteration_bounds = array<i64: 1>, scalar_prefetch = 0 : i64, scratch_operands = 0 : i64, tpu.core_type = #tpu.core_type<tc>, window_params = [{transform_indices = @transform_0, window_bounds = array<i64: 16, 256>}, {transform_indices = @transform_1, window_bounds = array<i64: 16, 128>}, {pipeline_mode = #tpu.pipeline_mode<synchronous>, transform_indices = @transform_2, window_bounds = array<i64: 256, 512>}, {pipeline_mode = #tpu.pipeline_mode<synchronous>, transform_indices = @transform_3, window_bounds = array<i64: 1, 512>}, {transform_indices = @transform_4, window_bounds = array<i64: 16, 128>}, {transform_indices = @transform_5, window_bounds = array<i64: 16, 128>}]} {
    %c0 = arith.constant 0 : index
    %c0_0 = arith.constant 0 : index
    %0 = vector.load %arg1[%c0, %c0_0] : memref<16x256xbf16, #tpu.memory_space<vmem>>, vector<16x256xbf16>
    %c0_1 = arith.constant 0 : index
    %c0_2 = arith.constant 0 : index
    %1 = vector.load %arg3[%c0_1, %c0_2] : memref<256x512xbf16, #tpu.memory_space<vmem>>, vector<256x512xbf16>
    %cst = arith.constant dense<0.000000e+00> : vector<16x512xf32>
    %2 = tpu.matmul %0, %1, %cst {dimension_numbers = #tpu.dot_dimension_numbers<[1], [0], [0], [1], [0, 0, 1, 1], [], []>} : vector<16x256xbf16>, vector<256x512xbf16>, vector<16x512xf32> -> vector<16x512xf32>
    %c0_3 = arith.constant 0 : index
    %c0_4 = arith.constant 0 : index
    %3 = vector.load %arg4[%c0_3, %c0_4] : memref<1x512xf32, #tpu.memory_space<vmem>>, vector<1x512xf32>
    %4 = vector.broadcast %3 : vector<1x512xf32> to vector<16x512xf32>
    %5 = arith.addf %2, %4 : vector<16x512xf32>
    %6 = vector.extract_strided_slice %5 {offsets = [0, 0], sizes = [16, 128], strides = [1, 1]} : vector<16x512xf32> to vector<16x128xf32>
    %7 = arith.negf %6 : vector<16x128xf32>
    %8 = math.exp %7 : vector<16x128xf32>
    %cst_5 = arith.constant 1.000000e+00 : f32
    %9 = vector.broadcast %cst_5 : f32 to vector<16x128xf32>
    %10 = arith.addf %9, %8 : vector<16x128xf32>
    %11 = arith.divf %9, %10 : vector<16x128xf32>
    %12 = vector.extract_strided_slice %5 {offsets = [0, 128], sizes = [16, 128], strides = [1, 1]} : vector<16x512xf32> to vector<16x128xf32>
    %13 = arith.negf %12 : vector<16x128xf32>
    %14 = math.exp %13 : vector<16x128xf32>
    %cst_6 = arith.constant 1.000000e+00 : f32
    %15 = vector.broadcast %cst_6 : f32 to vector<16x128xf32>
    %16 = arith.addf %15, %14 : vector<16x128xf32>
    %17 = arith.divf %15, %16 : vector<16x128xf32>
    %18 = vector.extract_strided_slice %5 {offsets = [0, 256], sizes = [16, 128], strides = [1, 1]} : vector<16x512xf32> to vector<16x128xf32>
    %19 = math.tanh %18 : vector<16x128xf32>
    %20 = vector.extract_strided_slice %5 {offsets = [0, 384], sizes = [16, 128], strides = [1, 1]} : vector<16x512xf32> to vector<16x128xf32>
    %21 = arith.negf %20 : vector<16x128xf32>
    %22 = math.exp %21 : vector<16x128xf32>
    %cst_7 = arith.constant 1.000000e+00 : f32
    %23 = vector.broadcast %cst_7 : f32 to vector<16x128xf32>
    %24 = arith.addf %23, %22 : vector<16x128xf32>
    %25 = arith.divf %23, %24 : vector<16x128xf32>
    %c0_8 = arith.constant 0 : index
    %c0_9 = arith.constant 0 : index
    %26 = vector.load %arg2[%c0_8, %c0_9] : memref<16x128xf32, #tpu.memory_space<vmem>>, vector<16x128xf32>
    %27 = arith.mulf %17, %26 : vector<16x128xf32>
    %28 = arith.mulf %11, %19 : vector<16x128xf32>
    %29 = arith.addf %27, %28 : vector<16x128xf32>
    %30 = math.tanh %29 : vector<16x128xf32>
    %31 = arith.mulf %25, %30 : vector<16x128xf32>
    %c0_10 = arith.constant 0 : index
    %c0_11 = arith.constant 0 : index
    %32 = vector.load %arg5[%c0_10, %c0_11] : memref<16x128xf32, #tpu.memory_space<vmem>>, vector<16x128xf32>
    tpu.vector_store %arg5[%c0_10, %c0_11], %31 {strides = array<i32>} : memref<16x128xf32, #tpu.memory_space<vmem>>, vector<16x128xf32>,
    %c0_12 = arith.constant 0 : index
    %c0_13 = arith.constant 0 : index
    %33 = vector.load %arg6[%c0_12, %c0_13] : memref<16x128xf32, #tpu.memory_space<vmem>>, vector<16x128xf32>
    tpu.vector_store %arg6[%c0_12, %c0_13], %29 {strides = array<i32>} : memref<16x128xf32, #tpu.memory_space<vmem>>, vector<16x128xf32>,
    return
  }
  func.func @transform_0(%arg0: i32) -> (i32, i32) {
    %c0_i32 = arith.constant 0 : i32
    %c0_i32_0 = arith.constant 0 : i32
    return %arg0, %c0_i32 : i32, i32
  }
  func.func @transform_1(%arg0: i32) -> (i32, i32) {
    %c0_i32 = arith.constant 0 : i32
    %c0_i32_0 = arith.constant 0 : i32
    return %arg0, %c0_i32 : i32, i32
  }
  func.func @transform_2(%arg0: i32) -> (i32, i32) {
    %c0_i32 = arith.constant 0 : i32
    %c0_i32_0 = arith.constant 0 : i32
    %c0_i32_1 = arith.constant 0 : i32
    return %c0_i32, %c0_i32_0 : i32, i32
  }
  func.func @transform_3(%arg0: i32) -> (i32, i32) {
    %c0_i32 = arith.constant 0 : i32
    %c0_i32_0 = arith.constant 0 : i32
    %c0_i32_1 = arith.constant 0 : i32
    return %c0_i32, %c0_i32_0 : i32, i32
  }
  func.func @transform_4(%arg0: i32) -> (i32, i32) {
    %c0_i32 = arith.constant 0 : i32
    %c0_i32_0 = arith.constant 0 : i32
    return %arg0, %c0_i32 : i32, i32
  }
  func.func @transform_5(%arg0: i32) -> (i32, i32) {
    %c0_i32 = arith.constant 0 : i32
    %c0_i32_0 = arith.constant 0 : i32
    return %arg0, %c0_i32 : i32, i32
  }
}

</mosaic_0001>

<bundles_post_ra>
// kernel: lstm_cell_forward.1
= control target key start
LH: loop header
LB: loop body
LE: loop exit
PB: predicated region body
PF: predicated region fallthrough
CT: control target
= control target key end

     0   :  { %11 = vsyncpa [#allocation3], 0  ;;  %s828_s18 = smov [#allocation2]   ;;  %s891_s0 = inlined_call_operand.vmem [shape: bf16[16,256], index: 0, kind: input, shape index: {}]   ;;  %s892_s1 = inlined_call_operand.vmem [shape: f32[16,128], index: 1, kind: input, shape index: {}]   ;;  %s893_s2 = inlined_call_operand.hbm [shape: bf16[256,512], index: 2, kind: input, shape index: {}]   ;;  %s894_s3 = inlined_call_operand.vmem [shape: f32[1,512], index: 3, kind: input, shape index: {}]   ;;  %s895_s4 = inlined_call_operand.vmem [shape: f32[16,128], index: 4, kind: output, shape index: {0}]   ;;  %s896_s5 = inlined_call_operand.vmem [shape: f32[16,128], index: 5, kind: output, shape index: {1}]  }
   0x1   :  { %s21_s19 = sshll.u32 %s828_s18, 4  ;;  %s22_s19 = int_to_ptr.vmem [resolvable:$true] %s21_s19 }
   0x2   :  { %s814_s20 = scalar_lea.vmem %s22_s19, 8192  ;;  %p819_p1 = scmp.lt.s32.totalorder %s22_s19, %s22_s19 }
   0x3   :  { %p815_p0 = scmp.ne.s32.totalorder %s22_s19, %s814_s20  ;;  %p820_p2 = scmp.lt.s32.totalorder %s814_s20, %s814_s20 }
   0x5   :  { %p821_p3 = por %p820_p2, %p819_p1 }
   0x7   :  { %p822_p4 = pnand %p821_p3, %p815_p0 }
   0x9   :  { %825 = shalt.err (!%p822_p4)
}
   0xa   :  { %s829_s21 = smov 256   ;;  %s830_s22 = smov 16  }
   0xb   :  { %27 = dma.hbm_to_vmem [thread:$0]  %s893_s2, 8192, %s22_s19, [#allocation3], %s829_s21, %s829_s21, %s830_s22  }
   0xc   :  { %826 = dma.done.wait [#allocation3], 8192  }
   0xd   :  { %827 = vsyncadd [#allocation3], 4294959104  ;;  %v675_v0 = vld [vmem:[#allocation2 + $0xe4] ss:$16 sps:$4 sm:$0xff]   ;;  %v677_v1 = vld [vmem:[#allocation2 + $0xe0] ss:$16 sps:$4 sm:$0xff]  }
   0xe   :  { %451 = vmatprep.subr.bf16.mxu0 %v675_v0  ;;  %v678_v2 = vld [vmem:[#allocation2 + $0xc4] ss:$16 sps:$4 sm:$0xff]   ;;  %v680_v3 = vld [vmem:[#allocation2 + $0xc0] ss:$16 sps:$4 sm:$0xff]   ;;  %v686_v5 = vld [vmem:[#allocation2 + $0xec] ss:$16 sps:$4 sm:$0xff]  }
   0xf   :  { %452 = vmatpush1.bf16.msra.mxu0 %v677_v1  ;;  %v681_v4 = vld [vmem:[#allocation2 + $0xa4] ss:$16 sps:$4 sm:$0xff]   ;;  %v689_v6 = vld [vmem:[#allocation2 + $0xe8] ss:$16 sps:$4 sm:$0xff]   ;;  %v683_v7 = vld [vmem:[#allocation2 + $0xa0] ss:$16 sps:$4 sm:$0xff]   ;;  %494 = vmatprep.subr.bf16.mxu1 %v686_v5 }
  0x10   :  { %453 = vmatprep.subr.bf16.mxu0 %v678_v2  ;;  %v684_v8 = vld [vmem:[#allocation2 + $0x84] ss:$16 sps:$4 sm:$0xff]   ;;  %495 = vmatpush1.bf16.msra.mxu1 %v689_v6  ;;  %v692_v9 = vld [vmem:[#allocation2 + $0xcc] ss:$16 sps:$4 sm:$0xff]   ;;  %v695_v10 = vld [vmem:[#allocation2 + $0xc8] ss:$16 sps:$4 sm:$0xff]   ;;  %v101_v2 = vlaneseq }
  0x11   :  { %496 = vmatprep.subr.bf16.mxu1 %v692_v9  ;;  %v688_v11 = vld [vmem:[#allocation2 + $0x80] ss:$16 sps:$4 sm:$0xff]   ;;  %v690_v12 = vld [vmem:[#allocation2 + $0x64] ss:$16 sps:$4 sm:$0xff]   ;;  %v698_v13 = vld [vmem:[#allocation2 + $0xac] ss:$16 sps:$4 sm:$0xff]  }
  0x12   :  { %v701_v14 = vld [vmem:[#allocation2 + $0xa8] ss:$16 sps:$4 sm:$0xff]   ;;  %v704_v15 = vld [vmem:[#allocation2 + $0x8c] ss:$16 sps:$4 sm:$0xff]   ;;  %v694_v16 = vld [vmem:[#allocation2 + $0x60] ss:$16 sps:$4 sm:$0xff]  }
  0x13   :  { %454 = vmatpush1.bf16.msra.mxu0 %v680_v3  ;;  %v696_v17 = vld [vmem:[#allocation2 + $0x44] ss:$16 sps:$4 sm:$0xff]   ;;  %v707_v18 = vld [vmem:[#allocation2 + $0x88] ss:$16 sps:$4 sm:$0xff]   ;;  %v710_v19 = vld [vmem:[#allocation2 + $0x6c] ss:$16 sps:$4 sm:$0xff]  }
  0x14   :  { %455 = vmatprep.subr.bf16.mxu0 %v681_v4  ;;  %497 = vmatpush1.bf16.msra.mxu1 %v695_v10  ;;  %v700_v20 = vld [vmem:[#allocation2 + $0x40] ss:$16 sps:$4 sm:$0xff]   ;;  %v702_v21 = vld [vmem:[#allocation2 + $0x24] ss:$16 sps:$4 sm:$0xff]   ;;  %v713_v22 = vld [vmem:[#allocation2 + $0x68] ss:$16 sps:$4 sm:$0xff]  }
  0x15   :  { %498 = vmatprep.subr.bf16.mxu1 %v698_v13  ;;  %v716_v23 = vld [vmem:[#allocation2 + $0x4c] ss:$16 sps:$4 sm:$0xff]   ;;  %v706_v24 = vld [vmem:[#allocation2 + $0x20] ss:$16 sps:$4 sm:$0xff]   ;;  %v708_v25 = vld [vmem:[#allocation2 + $0x4] ss:$16 sps:$4 sm:$0xff]  }
  0x16   :  { %v719_v26 = vld [vmem:[#allocation2 + $0x48] ss:$16 sps:$4 sm:$0xff]   ;;  %v722_v27 = vld [vmem:[#allocation2 + $0x2c] ss:$16 sps:$4 sm:$0xff]   ;;  %v712_v28 = vld [vmem:[#allocation2] ss:$16 sps:$4 sm:$0xff]  }
  0x17   :  { %456 = vmatpush1.bf16.msra.mxu0 %v683_v7  ;;  %v714_v29 = vld [vmem:[#allocation2 + $0x1e4] ss:$16 sps:$4 sm:$0xff]   ;;  %v725_v30 = vld [vmem:[#allocation2 + $0x28] ss:$16 sps:$4 sm:$0xff]   ;;  %v728_v31 = vld [vmem:[#allocation2 + $0xc] ss:$16 sps:$4 sm:$0xff]  }
  0x18   :  { %457 = vmatprep.subr.bf16.mxu0 %v684_v8  ;;  %499 = vmatpush1.bf16.msra.mxu1 %v701_v14  ;;  %v718_v32 = vld [vmem:[#allocation2 + $0x1e0] ss:$16 sps:$4 sm:$0xff]   ;;  %v720_v33 = vld [vmem:[#allocation2 + $0x1c4] ss:$16 sps:$4 sm:$0xff]   ;;  %v731_v34 = vld [vmem:[#allocation2 + $0x8] ss:$16 sps:$4 sm:$0xff]  }
  0x19   :  { %500 = vmatprep.subr.bf16.mxu1 %v704_v15  ;;  %v734_v35 = vld [vmem:[#allocation2 + $0x1ec] ss:$16 sps:$4 sm:$0xff]   ;;  %v724_v36 = vld [vmem:[#allocation2 + $0x1c0] ss:$16 sps:$4 sm:$0xff]   ;;  %v726_v37 = vld [vmem:[#allocation2 + $0x1a4] ss:$16 sps:$4 sm:$0xff]  }
  0x1a   :  { %v737_v38 = vld [vmem:[#allocation2 + $0x1e8] ss:$16 sps:$4 sm:$0xff]   ;;  %v740_v39 = vld [vmem:[#allocation2 + $0x1cc] ss:$16 sps:$4 sm:$0xff]   ;;  %v730_v40 = vld [vmem:[#allocation2 + $0x1a0] ss:$16 sps:$4 sm:$0xff]  }
  0x1b   :  { %458 = vmatpush1.bf16.msra.mxu0 %v688_v11  ;;  %v732_v41 = vld [vmem:[#allocation2 + $0x184] ss:$16 sps:$4 sm:$0xff]   ;;  %v743_v43 = vld [vmem:[#allocation2 + $0x1c8] ss:$16 sps:$4 sm:$0xff]   ;;  %v746_v44 = vld [vmem:[#allocation2 + $0x1ac] ss:$16 sps:$4 sm:$0xff]  }
  0x1c   :  { %459 = vmatprep.subr.bf16.mxu0 %v690_v12  ;;  %501 = vmatpush1.bf16.msra.mxu1 %v707_v18  ;;  %v764_v42 = vld [vmem:[%s891_s0 + $0x4] ss:$8 sps:$4 sm:$0xff]   ;;  %v736_v45 = vld [vmem:[#allocation2 + $0x180] ss:$16 sps:$4 sm:$0xff]   ;;  %v749_v47 = vld [vmem:[#allocation2 + $0x1a8] ss:$16 sps:$4 sm:$0xff]  }
  0x1d   :  { %502 = vmatprep.subr.bf16.mxu1 %v710_v19  ;;  %483 = vmatprep.mubr.bf16.mxu0 %v764_v42  ;;  %v738_v46 = vld [vmem:[#allocation2 + $0x164] ss:$16 sps:$4 sm:$0xff]   ;;  %v752_v48 = vld [vmem:[#allocation2 + $0x18c] ss:$16 sps:$4 sm:$0xff]   ;;  %v742_v49 = vld [vmem:[#allocation2 + $0x160] ss:$16 sps:$4 sm:$0xff]  }
  0x1e   :  { %526 = vmatprep.mubr.bf16.mxu1 %v764_v42  ;;  %v744_v50 = vld [vmem:[#allocation2 + $0x144] ss:$16 sps:$4 sm:$0xff]   ;;  %v755_v51 = vld [vmem:[#allocation2 + $0x188] ss:$16 sps:$4 sm:$0xff]   ;;  %v758_v52 = vld [vmem:[#allocation2 + $0x16c] ss:$16 sps:$4 sm:$0xff]  }
  0x1f   :  { %460 = vmatpush1.bf16.msra.mxu0 %v694_v16  ;;  %v748_v53 = vld [vmem:[#allocation2 + $0x140] ss:$16 sps:$4 sm:$0xff]   ;;  %v750_v54 = vld [vmem:[#allocation2 + $0x124] ss:$16 sps:$4 sm:$0xff]   ;;  %v761_v55 = vld [vmem:[#allocation2 + $0x168] ss:$16 sps:$4 sm:$0xff]  }
  0x20   :  { %461 = vmatprep.subr.bf16.mxu0 %v696_v17  ;;  %503 = vmatpush1.bf16.msra.mxu1 %v713_v22  ;;  %v765_v56 = vld [vmem:[#allocation2 + $0x14c] ss:$16 sps:$4 sm:$0xff]   ;;  %v754_v57 = vld [vmem:[#allocation2 + $0x120] ss:$16 sps:$4 sm:$0xff]   ;;  %v756_v58 = vld [vmem:[#allocation2 + $0x104] ss:$16 sps:$4 sm:$0xff]  }
  0x21   :  { %504 = vmatprep.subr.bf16.mxu1 %v716_v23  ;;  %v767_v59 = vld [vmem:[#allocation2 + $0x148] ss:$16 sps:$4 sm:$0xff]   ;;  %v768_v60 = vld [vmem:[#allocation2 + $0x12c] ss:$16 sps:$4 sm:$0xff]   ;;  %v760_v61 = vld [vmem:[#allocation2 + $0x100] ss:$16 sps:$4 sm:$0xff]  }
  0x22   :  { %v770_v62 = vld [vmem:[#allocation2 + $0x128] ss:$16 sps:$4 sm:$0xff]   ;;  %v771_v63 = vld [vmem:[#allocation2 + $0x10c] ss:$16 sps:$4 sm:$0xff]   ;;  %v102_v3 = vshrl.u32 %v101_v2, 7 }
  0x23   :  { %462 = vmatpush1.bf16.msra.mxu0 %v700_v20  ;;  %v762_v0 = vld [vmem:[%s891_s0] ss:$8 sps:$4 sm:$0xff]  }
  0x24   :  { %463 = vmatprep.subr.bf16.mxu0 %v702_v21  ;;  %505 = vmatpush1.bf16.msra.mxu1 %v719_v26  ;;  %v773_v1 = vld [vmem:[#allocation2 + $0x108] ss:$16 sps:$4 sm:$0xff]   ;;  %v103_v4 = vsub.s32 0, %v102_v3  ;;  %v99_v5 = vld [vmem:[%s894_s3] sm:$0xf]  ;;  %v107_v6 = vsub.s32 1, %v102_v3 }
  0x25   :  { %506 = vmatprep.subr.bf16.mxu1 %v722_v27  ;;  %v115_v15 = vsub.s32 3, %v102_v3  ;;  %v111_v22 = vsub.s32 2, %v102_v3 }
  0x26   :  { %v104_v7 = vrot.slane %v99_v5, %v103_v4  ;;  %v108_v8 = vrot.slane %v99_v5, %v107_v6 }
  0x27   :  { %464 = vmatpush1.bf16.msra.mxu0 %v706_v24  ;;  %v116_v24 = vrot.slane %v99_v5, %v115_v15  ;;  %v112_v27 = vrot.slane %v99_v5, %v111_v22 }
  0x28   :  { %465 = vmatprep.subr.bf16.mxu0 %v708_v25  ;;  %507 = vmatpush1.bf16.msra.mxu1 %v725_v30 }
  0x29   :  { %508 = vmatprep.subr.bf16.mxu1 %v728_v31 }
  0x2b   :  { %466 = vmatpush1.bf16.msra.mxu0 %v712_v28 }
  0x2c   :  { %467 = vmatprep.subr.bf16.mxu0 %v714_v29  ;;  %509 = vmatpush1.bf16.msra.mxu1 %v731_v34 }
  0x2d   :  { %510 = vmatprep.subr.bf16.mxu1 %v734_v35 }
  0x2f   :  { %468 = vmatpush2.bf16.msra.mxu0 %v718_v32 }
  0x30   :  { %469 = vmatprep.subr.bf16.mxu0 %v720_v33  ;;  %511 = vmatpush2.bf16.msra.mxu1 %v737_v38 }
  0x31   :  { %512 = vmatprep.subr.bf16.mxu1 %v740_v39 }
  0x33   :  { %470 = vmatpush2.bf16.msra.mxu0 %v724_v36 }
  0x34   :  { %471 = vmatprep.subr.bf16.mxu0 %v726_v37  ;;  %513 = vmatpush2.bf16.msra.mxu1 %v743_v43 }
  0x35   :  { %514 = vmatprep.subr.bf16.mxu1 %v746_v44 }
  0x37   :  { %472 = vmatpush2.bf16.msra.mxu0 %v730_v40 }
  0x38   :  { %473 = vmatprep.subr.bf16.mxu0 %v732_v41  ;;  %515 = vmatpush2.bf16.msra.mxu1 %v749_v47 }
  0x39   :  { %516 = vmatprep.subr.bf16.mxu1 %v752_v48 }
  0x3b   :  { %474 = vmatpush2.bf16.msra.mxu0 %v736_v45 }
  0x3c   :  { %475 = vmatprep.subr.bf16.mxu0 %v738_v46  ;;  %517 = vmatpush2.bf16.msra.mxu1 %v755_v51  ;;  %v575_v46 = vld [vmem:[%s892_s1] sm:$0xff] }
  0x3d   :  { %518 = vmatprep.subr.bf16.mxu1 %v758_v52 }
  0x3f   :  { %476 = vmatpush2.bf16.msra.mxu0 %v742_v49 }
  0x40   :  { %477 = vmatprep.subr.bf16.mxu0 %v744_v50  ;;  %519 = vmatpush2.bf16.msra.mxu1 %v761_v55 }
  0x41   :  { %520 = vmatprep.subr.bf16.mxu1 %v765_v56 }
  0x43   :  { %478 = vmatpush2.bf16.msra.mxu0 %v748_v53  ;;  %v576_v53 = vld [vmem:[%s892_s1 + $0x8] sm:$0xff] }
  0x44   :  { %479 = vmatprep.subr.bf16.mxu0 %v750_v54  ;;  %521 = vmatpush2.bf16.msra.mxu1 %v767_v59 }
  0x45   :  { %522 = vmatprep.subr.bf16.mxu1 %v768_v60 }
  0x47   :  { %480 = vmatpush2.bf16.msra.mxu0 %v754_v57 }
  0x48   :  { %481 = vmatprep.subr.bf16.mxu0 %v756_v58  ;;  %523 = vmatpush2.bf16.msra.mxu1 %v770_v62 }
  0x49   :  { %524 = vmatprep.subr.bf16.mxu1 %v771_v63 }
  0x4b   :  { %482 = vmatpush2.bf16.msra.mxu0 %v760_v61 }
  0x4c   :  { %525 = vmatpush2.bf16.msra.mxu1 %v773_v1 }
  0x4e   :  { %484 = vmatmul.mubr.bf16.vlgmr.msra.gmra.mxu0 %v762_v0 }
  0x4f   :  { %527 = vmatmul.mubr.bf16.vlgmr.msra.gmra.mxu1 %v762_v0 }
 0x10e   :  { %v485_v9 = vpop.f32.mrf.mxu0 }
 0x10f   :  { %v486_v10 = vadd.f32 %v485_v9, %v104_v7  ;;  %v528_v18 = vpop.f32.mrf.mxu1 }
 0x110   :  { %v487_v11 = vpop.f32.mrf.mxu0  ;;  %v529_v30 = vadd.f32 %v528_v18, %v112_v27 }
 0x111   :  { %v666_v12 = vmul.f32 -1.442695, %v486_v10  ;;  %v488_v13 = vadd.f32 %v487_v11, %v108_v8  ;;  %v530_v23 = vpop.f32.mrf.mxu1 }
 0x112   :  { %v489_v14 = vpop.f32.mrf.mxu0  ;;  %v531_v28 = vadd.f32 %v530_v23, %v116_v24 }
 0x113   :  { %774 = vpow2.f32 %v666_v12  ;;  %v668_v16 = vmul.f32 -1.442695, %v488_v13  ;;  %v490_v17 = vadd.f32 %v489_v14, %v104_v7  ;;  %v532_v26 = vpop.f32.mrf.mxu1 }
 0x114   :  { %v491_v19 = vpop.f32.mrf.mxu0  ;;  %v670_v31 = vmul.f32 -1.442695, %v531_v28  ;;  %v533_v39 = vadd.f32 %v532_v26, %v112_v27 }
 0x115   :  { %776 = vpow2.f32 %v668_v16  ;;  %v667_v20 = vmul.f32 -1.442695, %v490_v17  ;;  %v492_v21 = vadd.f32 %v491_v19, %v108_v8  ;;  %v534_v29 = vpop.f32.mrf.mxu1 }
 0x116   :  { %v535_v32 = vadd.f32 %v534_v29, %v116_v24 }
 0x117   :  { %778 = vpow2.f32 %v667_v20  ;;  %v669_v25 = vmul.f32 -1.442695, %v492_v21 }
 0x118   :  { %v671_v36 = vmul.f32 -1.442695, %v535_v32 }
 0x119   :  { %780 = vpow2.f32 %v669_v25 }
 0x11a   :  { %782 = vtanh.f32 %v529_v30 }
 0x11b   :  { %784 = vpow2.f32 %v670_v31 }
 0x120   :  { %v775_v33 = vpop.eup %774 }
 0x121   :  { %v543_v34 = vadd.f32 1.0, %v775_v33 }
 0x122   :  { %v777_v35 = vpop.eup %776 }
 0x123   :  { %786 = vrcp.f32 %v543_v34  ;;  %v555_v37 = vadd.f32 1.0, %v777_v35 }
 0x124   :  { %v779_v38 = vpop.eup %778 }
 0x125   :  { %788 = vrcp.f32 %v555_v37  ;;  %v544_v40 = vadd.f32 1.0, %v779_v38 }
 0x126   :  { %v781_v41 = vpop.eup %780  ;;  %790 = vpow2.f32 %v671_v36 }
 0x127   :  { %792 = vrcp.f32 %v544_v40  ;;  %v556_v42 = vadd.f32 1.0, %v781_v41  ;;  %v783_v43 = vpop.eup %782 }
 0x128   :  { %794 = vtanh.f32 %v533_v39  ;;  %v785_v44 = vpop.eup %784 }
 0x129   :  { %796 = vrcp.f32 %v556_v42  ;;  %v569_v48 = vadd.f32 1.0, %v785_v44 }
 0x12b   :  { %798 = vrcp.f32 %v569_v48 }
 0x130   :  { %v787_v45 = vpop.eup %786 }
 0x131   :  { %v579_v51 = vmul.f32 %v787_v45, %v783_v43 }
 0x132   :  { %v789_v47 = vpop.eup %788 }
 0x133   :  { %v791_v49 = vpop.eup %790  ;;  %v577_v50 = vmul.f32 %v789_v47, %v575_v46 }
 0x134   :  { %v793_v52 = vpop.eup %792  ;;  %v570_v57 = vadd.f32 1.0, %v791_v49 }
 0x135   :  { %v795_v54 = vpop.eup %794  ;;  %v581_v55 = vadd.f32 %v579_v51, %v577_v50 }
 0x136   :  { %v797_v56 = vpop.eup %796  ;;  %v580_v59 = vmul.f32 %v795_v54, %v793_v52 }
 0x137   :  { %800 = vtanh.f32 %v581_v55  ;;  %589 = vst [vmem:[%s896_s5] sm:$0xff] %v581_v55  ;;  %v578_v58 = vmul.f32 %v797_v56, %v576_v53 }
 0x138   :  { %802 = vrcp.f32 %v570_v57  ;;  %v799_v61 = vpop.eup %798 }
 0x139   :  { %v582_v60 = vadd.f32 %v580_v59, %v578_v58 }
 0x13b   :  { %804 = vtanh.f32 %v582_v60  ;;  %590 = vst [vmem:[%s896_s5 + $0x8] sm:$0xff] %v582_v60 }
 0x144   :  { %v801_v62 = vpop.eup %800 }
 0x145   :  { %v585_v63 = vmul.f32 %v801_v62, %v799_v61  ;;  %v803_v0 = vpop.eup %802 }
 0x147   :  { %587 = vst [vmem:[%s895_s4] sm:$0xff] %v585_v63 }
 0x148   :  { %v805_v1 = vpop.eup %804 }
 0x149   :  { %v586_v2 = vmul.f32 %v805_v1, %v803_v0 }
 0x14b   :  { %588 = vst [vmem:[%s895_s4 + $0x8] sm:$0xff] %v586_v2 }
 0x14c   :  { %599 = vsyncpa [#allocation3], 1 }

</bundles_post_ra>
